<compile_context>
chip_gen: v7x
topology: tpu7x:2x2x1
jax: 0.10.0
libtpu: 0.0.40
codegen_flags: <defaults>
</compile_context>

<pallas_src>
import functools

import jax
import jax.numpy as jnp
from jax.experimental import pallas as pl
from jax.experimental.pallas import tpu as pltpu


# ----------------------------------------------------------------------------
# Kernel
# ----------------------------------------------------------------------------
def dueling_dqn_kernel(x_ref, w1_ref, b1_ref, w2_ref, b2_ref, wh_ref, bh_ref,
                       out_ref):
    """Fused dueling-DQN forward for one batch tile.

    x  : (tb, state_dim)        f32
    w1 : (state_dim, fc1_dim)   f32 ; b1 : (1, fc1_dim)  f32
    w2 : (fc1_dim, fc2_dim)     f32 ; b2 : (1, fc2_dim)  f32
    wh : (fc2_dim, head_pad)    f32 ; bh : (1, head_pad) f32   [V || A || 0-pad]
    out: (tb, head_pad)         bf16 (lane-dense combined V/A slab)
    """
    x = x_ref[...]

    # fc1 + ReLU (f32 accumulate on the MXU)
    l1 = jnp.dot(x, w1_ref[...], preferred_element_type=jnp.float32) + b1_ref[...]
    l1 = jnp.maximum(l1, 0.0)

    # fc2 + ReLU
    l2 = jnp.dot(l1, w2_ref[...], preferred_element_type=jnp.float32) + b2_ref[...]
    l2 = jnp.maximum(l2, 0.0)

    # Fused V/A head: one matmul, one lane-dense unmasked bf16 store.
    out_ref[...] = (jnp.dot(l2, wh_ref[...], preferred_element_type=jnp.float32)
                    + bh_ref[...]).astype(out_ref.dtype)


# ----------------------------------------------------------------------------
# One-time parameter packing (run once per weight update, NOT per forward)
# ----------------------------------------------------------------------------
def _round_up(x, m):
    return (x + m - 1) // m * m


def pack_params(params):
    """Fuse the V/A heads into a single 128-lane-padded head matrix.

    Returns a dict of f32 arrays ready to feed the Pallas kernel. Call this
    once after every optimizer step and reuse the result across forwards.
    """
    n_actions = params["wa"].shape[1]
    head_out = 1 + n_actions
    head_pad = _round_up(head_out, 128)   # lane-dense output width

    wh = jnp.concatenate([params["wv"], params["wa"]], axis=1)
    bh = jnp.concatenate([params["bv"], params["ba"]], axis=1)
    wh = jnp.pad(wh, ((0, 0), (0, head_pad - head_out))).astype(jnp.float32)
    bh = jnp.pad(bh, ((0, 0), (0, head_pad - head_out))).astype(jnp.float32)

    return dict(
        w1=params["w1"].astype(jnp.float32), b1=params["b1"].astype(jnp.float32),
        w2=params["w2"].astype(jnp.float32), b2=params["b2"].astype(jnp.float32),
        wh=wh, bh=bh)


# ----------------------------------------------------------------------------
# Forward wrapper
# ----------------------------------------------------------------------------
def _batch_tile(B):
    """Batch tile: single grid step for small/medium B (grid steps are pure
    serial overhead on single-TC v5e/v6e); >=2 parallel steps for large B so
    both TensorCores are used on v7x. VMEM is never a constraint here."""
    b8 = _round_up(max(B, 1), 8)
    if b8 <= 256:
        return b8
    return min(1024, _round_up((b8 + 1) // 2, 8))


@functools.partial(jax.jit, static_argnames=("n_actions",))
def dueling_dqn_forward(state, packed, *, n_actions):
    """state: (B, state_dim) f32.  Returns (V, A) = ((B, 1), (B, n_actions)) f32."""
    B, state_dim = state.shape
    fc1_dim = packed["w1"].shape[1]
    fc2_dim = packed["w2"].shape[1]
    head_pad = packed["wh"].shape[1]
    head_out = 1 + n_actions

    tb = _batch_tile(B)
    B_pad = _round_up(B, tb)

    x = state.astype(jnp.float32)
    if B_pad != B:
        # Zero-padded rows compute relu(b)-derived junk; sliced away below.
        x = jnp.pad(x, ((0, B_pad - B), (0, 0)))

    resident = lambda i: (0, 0)   # weights pinned in VMEM across batch tiles

    out = pl.pallas_call(
        dueling_dqn_kernel,
        out_shape=jax.ShapeDtypeStruct((B_pad, head_pad), jnp.bfloat16),
        grid_spec=pltpu.PrefetchScalarGridSpec(
            num_scalar_prefetch=0,
            grid=(B_pad // tb,),
            in_specs=[
                pl.BlockSpec((tb, state_dim), lambda i: (i, 0)),
                pl.BlockSpec((state_dim, fc1_dim), resident),
                pl.BlockSpec((1, fc1_dim), resident),
                pl.BlockSpec((fc1_dim, fc2_dim), resident),
                pl.BlockSpec((1, fc2_dim), resident),
                pl.BlockSpec((fc2_dim, head_pad), resident),
                pl.BlockSpec((1, head_pad), resident),
            ],
            out_specs=pl.BlockSpec((tb, head_pad), lambda i: (i, 0)),
        ),
        compiler_params=pltpu.CompilerParams(
            dimension_semantics=("parallel",)),
    )(x, packed["w1"], packed["b1"], packed["w2"], packed["b2"],
      packed["wh"], packed["bh"])

    V = out[:B, :1].astype(jnp.float32)
    A = out[:B, 1:head_out].astype(jnp.float32)
    return V, A


# ----------------------------------------------------------------------------
# Parameter init (PyTorch-style uniform +-1/sqrt(fan_in)) and f32 reference
# ----------------------------------------------------------------------------
def init_params(key, state_dim, fc1_dim, fc2_dim, n_actions):
    def linear(k, fan_in, fan_out):
        kw, kb = jax.random.split(k)
        bound = 1.0 / jnp.sqrt(jnp.float32(fan_in))
        w = jax.random.uniform(kw, (fan_in, fan_out), jnp.float32, -bound, bound)
        b = jax.random.uniform(kb, (1, fan_out), jnp.float32, -bound, bound)
        return w, b

    k1, k2, k3, k4 = jax.random.split(key, 4)
    w1, b1 = linear(k1, state_dim, fc1_dim)
    w2, b2 = linear(k2, fc1_dim, fc2_dim)
    wv, bv = linear(k3, fc2_dim, 1)
    wa, ba = linear(k4, fc2_dim, n_actions)
    return dict(w1=w1, b1=b1, w2=w2, b2=b2, wv=wv, bv=bv, wa=wa, ba=ba)


def reference_forward(state, p):
    """Plain-JAX f32 reference of the same forward (returns (V, A), per spec)."""
    l1 = jnp.maximum(state @ p["w1"] + p["b1"], 0.0)
    l2 = jnp.maximum(l1 @ p["w2"] + p["b2"], 0.0)
    return l2 @ p["wv"] + p["bv"], l2 @ p["wa"] + p["ba"]


# TODO(synk): training machinery (Adam optimizer, MSELoss, .to(device)) is host-side
# PyTorch plumbing with no Pallas equivalent; only the forward pass is implemented.

if __name__ == "__main__":
    # Small shapes consistent with the module:
    #   state_shape=(16,), fc1_dim=64, fc2_dim=32, n_actions=4, batch=8
    B, state_dim, fc1_dim, fc2_dim, n_actions = 8, 16, 64, 32, 4

    key = jax.random.PRNGKey(0)
    k_params, k_state = jax.random.split(key)
    params = init_params(k_params, state_dim, fc1_dim, fc2_dim, n_actions)
    state = jax.random.normal(k_state, (B, state_dim), jnp.float32)

    # One-time packing (would be re-run only after a weight update).
    packed = pack_params(params)

    V, A = dueling_dqn_forward(state, packed, n_actions=n_actions)
    V = jax.block_until_ready(V)
    A = jax.block_until_ready(A)

    # Sanity check against the f32 reference (bf16 output store -> relaxed tol).
    V_ref, A_ref = reference_forward(state, params)
    assert V.shape == (B, 1) and A.shape == (B, n_actions)
    assert jnp.allclose(V, V_ref, atol=5e-2, rtol=5e-2), (
        f"V mismatch: max abs err {jnp.max(jnp.abs(V - V_ref))}")
    assert jnp.allclose(A, A_ref, atol=5e-2, rtol=5e-2), (
        f"A mismatch: max abs err {jnp.max(jnp.abs(A - A_ref))}")

    print("KERNEL_OK")
</pallas_src>

<mosaic_0001>
module attributes {stable_mosaic.version = 11 : i64} {
  func.func @dueling_dqn_kernel(%arg0: i32, %arg1: memref<8x16xf32, #tpu.memory_space<vmem>>, %arg2: memref<16x64xf32, #tpu.memory_space<vmem>>, %arg3: memref<1x64xf32, #tpu.memory_space<vmem>>, %arg4: memref<64x32xf32, #tpu.memory_space<vmem>>, %arg5: memref<1x32xf32, #tpu.memory_space<vmem>>, %arg6: memref<32x128xf32, #tpu.memory_space<vmem>>, %arg7: memref<1x128xf32, #tpu.memory_space<vmem>>, %arg8: memref<8x128xbf16, #tpu.memory_space<vmem>>) attributes {dimension_semantics = [#tpu.dimension_semantics<parallel>], iteration_bounds = array<i64: 1>, scalar_prefetch = 0 : i64, scratch_operands = 0 : i64, tpu.core_type = #tpu.core_type<tc>, window_params = [{transform_indices = @transform_0, window_bounds = array<i64: 8, 16>}, {pipeline_mode = #tpu.pipeline_mode<synchronous>, transform_indices = @transform_1, window_bounds = array<i64: 16, 64>}, {pipeline_mode = #tpu.pipeline_mode<synchronous>, transform_indices = @transform_2, window_bounds = array<i64: 1, 64>}, {pipeline_mode = #tpu.pipeline_mode<synchronous>, transform_indices = @transform_3, window_bounds = array<i64: 64, 32>}, {pipeline_mode = #tpu.pipeline_mode<synchronous>, transform_indices = @transform_4, window_bounds = array<i64: 1, 32>}, {pipeline_mode = #tpu.pipeline_mode<synchronous>, transform_indices = @transform_5, window_bounds = array<i64: 32, 128>}, {pipeline_mode = #tpu.pipeline_mode<synchronous>, transform_indices = @transform_6, window_bounds = array<i64: 1, 128>}, {transform_indices = @transform_7, window_bounds = array<i64: 8, 128>}]} {
    %c0 = arith.constant 0 : index
    %c0_0 = arith.constant 0 : index
    %0 = vector.load %arg1[%c0, %c0_0] : memref<8x16xf32, #tpu.memory_space<vmem>>, vector<8x16xf32>
    %c0_1 = arith.constant 0 : index
    %c0_2 = arith.constant 0 : index
    %1 = vector.load %arg2[%c0_1, %c0_2] : memref<16x64xf32, #tpu.memory_space<vmem>>, vector<16x64xf32>
    %cst = arith.constant dense<0.000000e+00> : vector<8x64xf32>
    %2 = tpu.matmul %0, %1, %cst {dimension_numbers = #tpu.dot_dimension_numbers<[1], [0], [0], [1], [0, 0, 1, 1], [], []>} : vector<8x16xf32>, vector<16x64xf32>, vector<8x64xf32> -> vector<8x64xf32>
    %c0_3 = arith.constant 0 : index
    %c0_4 = arith.constant 0 : index
    %3 = vector.load %arg3[%c0_3, %c0_4] : memref<1x64xf32, #tpu.memory_space<vmem>>, vector<1x64xf32>
    %4 = vector.broadcast %3 : vector<1x64xf32> to vector<8x64xf32>
    %5 = arith.addf %2, %4 : vector<8x64xf32>
    %cst_5 = arith.constant 0.000000e+00 : f32
    %6 = vector.broadcast %cst_5 : f32 to vector<8x64xf32>
    %7 = arith.maximumf %5, %6 : vector<8x64xf32>
    %c0_6 = arith.constant 0 : index
    %c0_7 = arith.constant 0 : index
    %8 = vector.load %arg4[%c0_6, %c0_7] : memref<64x32xf32, #tpu.memory_space<vmem>>, vector<64x32xf32>
    %cst_8 = arith.constant dense<0.000000e+00> : vector<8x32xf32>
    %9 = tpu.matmul %7, %8, %cst_8 {dimension_numbers = #tpu.dot_dimension_numbers<[1], [0], [0], [1], [0, 0, 1, 1], [], []>} : vector<8x64xf32>, vector<64x32xf32>, vector<8x32xf32> -> vector<8x32xf32>
    %c0_9 = arith.constant 0 : index
    %c0_10 = arith.constant 0 : index
    %10 = vector.load %arg5[%c0_9, %c0_10] : memref<1x32xf32, #tpu.memory_space<vmem>>, vector<1x32xf32>
    %11 = vector.broadcast %10 : vector<1x32xf32> to vector<8x32xf32>
    %12 = arith.addf %9, %11 : vector<8x32xf32>
    %cst_11 = arith.constant 0.000000e+00 : f32
    %13 = vector.broadcast %cst_11 : f32 to vector<8x32xf32>
    %14 = arith.maximumf %12, %13 : vector<8x32xf32>
    %c0_12 = arith.constant 0 : index
    %c0_13 = arith.constant 0 : index
    %15 = vector.load %arg6[%c0_12, %c0_13] : memref<32x128xf32, #tpu.memory_space<vmem>>, vector<32x128xf32>
    %cst_14 = arith.constant dense<0.000000e+00> : vector<8x128xf32>
    %16 = tpu.matmul %14, %15, %cst_14 {dimension_numbers = #tpu.dot_dimension_numbers<[1], [0], [0], [1], [0, 0, 1, 1], [], []>} : vector<8x32xf32>, vector<32x128xf32>, vector<8x128xf32> -> vector<8x128xf32>
    %c0_15 = arith.constant 0 : index
    %c0_16 = arith.constant 0 : index
    %17 = vector.load %arg7[%c0_15, %c0_16] : memref<1x128xf32, #tpu.memory_space<vmem>>, vector<1x128xf32>
    %18 = vector.broadcast %17 : vector<1x128xf32> to vector<8x128xf32>
    %19 = arith.addf %16, %18 : vector<8x128xf32>
    %20 = arith.truncf %19 : vector<8x128xf32> to vector<8x128xbf16>
    %c0_17 = arith.constant 0 : index
    %c0_18 = arith.constant 0 : index
    %21 = vector.load %arg8[%c0_17, %c0_18] : memref<8x128xbf16, #tpu.memory_space<vmem>>, vector<8x128xbf16>
    tpu.vector_store %arg8[%c0_17, %c0_18], %20 {strides = array<i32>} : memref<8x128xbf16, #tpu.memory_space<vmem>>, vector<8x128xbf16>,
    return
  }
  func.func @transform_0(%arg0: i32) -> (i32, i32) {
    %c0_i32 = arith.constant 0 : i32
    %c0_i32_0 = arith.constant 0 : i32
    return %arg0, %c0_i32 : i32, i32
  }
  func.func @transform_1(%arg0: i32) -> (i32, i32) {
    %c0_i32 = arith.constant 0 : i32
    %c0_i32_0 = arith.constant 0 : i32
    %c0_i32_1 = arith.constant 0 : i32
    return %c0_i32, %c0_i32_0 : i32, i32
  }
  func.func @transform_2(%arg0: i32) -> (i32, i32) {
    %c0_i32 = arith.constant 0 : i32
    %c0_i32_0 = arith.constant 0 : i32
    %c0_i32_1 = arith.constant 0 : i32
    return %c0_i32, %c0_i32_0 : i32, i32
  }
  func.func @transform_3(%arg0: i32) -> (i32, i32) {
    %c0_i32 = arith.constant 0 : i32
    %c0_i32_0 = arith.constant 0 : i32
    %c0_i32_1 = arith.constant 0 : i32
    return %c0_i32, %c0_i32_0 : i32, i32
  }
  func.func @transform_4(%arg0: i32) -> (i32, i32) {
    %c0_i32 = arith.constant 0 : i32
    %c0_i32_0 = arith.constant 0 : i32
    %c0_i32_1 = arith.constant 0 : i32
    return %c0_i32, %c0_i32_0 : i32, i32
  }
  func.func @transform_5(%arg0: i32) -> (i32, i32) {
    %c0_i32 = arith.constant 0 : i32
    %c0_i32_0 = arith.constant 0 : i32
    %c0_i32_1 = arith.constant 0 : i32
    return %c0_i32, %c0_i32_0 : i32, i32
  }
  func.func @transform_6(%arg0: i32) -> (i32, i32) {
    %c0_i32 = arith.constant 0 : i32
    %c0_i32_0 = arith.constant 0 : i32
    %c0_i32_1 = arith.constant 0 : i32
    return %c0_i32, %c0_i32_0 : i32, i32
  }
  func.func @transform_7(%arg0: i32) -> (i32, i32) {
    %c0_i32 = arith.constant 0 : i32
    %c0_i32_0 = arith.constant 0 : i32
    return %arg0, %c0_i32 : i32, i32
  }
}

</mosaic_0001>

<bundles_post_ra>
// kernel: dueling_dqn_forward.1
= control target key start
LH: loop header
LB: loop body
LE: loop exit
PB: predicated region body
PF: predicated region fallthrough
CT: control target
= control target key end

     0   :  { %v376_v0 = vmov 0.0|0.0   ;;  %vm377_vm0 = vmmov 0   ;;  %v378_v3 = vmov 0.0   ;;  %vm36_vm1 = vcmask 130048   ;;  %s479_s1 = inlined_call_operand.vmem [shape: f32[16,64], index: 1, kind: input, shape index: {}]   ;;  %s480_s3 = inlined_call_operand.vmem [shape: f32[64,32], index: 3, kind: input, shape index: {}]   ;;  %s481_s0 = inlined_call_operand.vmem [shape: f32[8,16], index: 0, kind: input, shape index: {}]   ;;  %s482_s5 = inlined_call_operand.vmem [shape: f32[32,128], index: 5, kind: input, shape index: {}]   ;;  %s483_s2 = inlined_call_operand.vmem [shape: f32[1,64], index: 2, kind: input, shape index: {}]   ;;  %s484_s4 = inlined_call_operand.vmem [shape: f32[1,32], index: 4, kind: input, shape index: {}]   ;;  %s485_s6 = inlined_call_operand.vmem [shape: f32[1,128], index: 6, kind: input, shape index: {}]   ;;  %s486_s7 = inlined_call_operand.vmem [shape: bf16[8,128], index: 7, kind: output, shape index: {}]  }
   0x1   :  { %352 = vmatprep.subr.bf16.mxu0 %v376_v0  ;;  %v27_v1 = vld [vmem:[%s479_s1] sm:$0xff]  ;;  %v28_v2 = vld [vmem:[%s479_s1 + $0x8] sm:$0xff]  ;;  %319 = vmatprep.mubr.msk.f32.mxu0 %vm377_vm0, %v378_v3  ;;  %v113_v7 = vld [vmem:[%s480_s3 + $0x10] sm:$0xff]  ;;  %vm126_vm2 = vcmask 523264   ;;  %vm212_vm3 = vcmask 261120  }
   0x2   :  { %v353_v4 = vpack.c.bf16 %v28_v2, %v27_v1  ;;  %355 = vmatprep.subr.bf16.mxu1 %v376_v0  ;;  %v111_v5 = vld [vmem:[%s480_s3] sm:$0xff]  ;;  %v112_v6 = vld [vmem:[%s480_s3 + $0x8] sm:$0xff]  ;;  %338 = vmatprep.mubr.msk.f32.mxu1 %vm377_vm0, %v378_v3  ;;  %v114_v9 = vld [vmem:[%s480_s3 + $0x18] sm:$0xff] }
   0x3   :  { %v356_v8 = vpack.c.bf16 %v112_v6, %v111_v5  ;;  %v26_v10 = vld [vmem:[%s481_s0] sm:$0xff]  ;;  %v359_v11 = vpack.c.bf16 %v114_v9, %v113_v7  ;;  %v116_v13 = vld [vmem:[%s480_s3 + $0x28] sm:$0xff]  ;;  %v117_v15 = vld [vmem:[%s480_s3 + $0x30] sm:$0xff] }
   0x4   :  { %354 = vmatpush3.bf16.msra.mxu0 %v353_v4  ;;  %v115_v12 = vld [vmem:[%s480_s3 + $0x20] sm:$0xff]  ;;  %v118_v16 = vld [vmem:[%s480_s3 + $0x38] sm:$0xff]  ;;  %v202_v19 = vld [vmem:[%s482_s5 + $0x8] sm:$0xff] }
   0x5   :  { %357 = vmatpush3.bf16.msra.mxu1 %v356_v8  ;;  %367 = vmatprep.subr.bf16.mxu0 %v376_v0  ;;  %v362_v14 = vpack.c.bf16 %v116_v13, %v115_v12  ;;  %v365_v17 = vpack.c.bf16 %v118_v16, %v117_v15  ;;  %v201_v18 = vld [vmem:[%s482_s5] sm:$0xff]  ;;  %v203_v26 = vld [vmem:[%s482_s5 + $0x10] sm:$0xff]  ;;  %v204_v27 = vld [vmem:[%s482_s5 + $0x18] sm:$0xff] }
   0x6   :  { %358 = vmatprep.subr.bf16.mxu1 %v376_v0  ;;  %v368_v20 = vpack.c.bf16 %v202_v19, %v201_v18  ;;  %v292_v21 = vld [vmem:[%s483_s2] ss:$0 sm:$0xff]  ;;  %v371_v28 = vpack.c.bf16 %v204_v27, %v203_v26 }
   0x7   :  { %320 = vmatmul.mubr.msk.f32.vlgmr.msra.gmra.mrb[0].mxu0 %vm36_vm1, %v26_v10  ;;  %v294_v29 = vld [vmem:[%s484_s4] ss:$0 sm:$0xff] }
   0x8   :  { %349 = vmatprep.mubr.msk.f32.mxu0 %vm377_vm0, %v378_v3  ;;  %369 = vmatpush3.bf16.msra.mxu0 %v368_v20  ;;  %v296_v34 = vld [vmem:[%s485_s6] ss:$0 sm:$0xff] }
   0x9   :  { %360 = vmatpush3.bf16.msra.mxu1 %v359_v11  ;;  %370 = vmatprep.subr.bf16.mxu0 %v376_v0 }
   0xa   :  { %361 = vmatprep.subr.bf16.mxu1 %v376_v0 }
   0xc   :  { %372 = vmatpush3.bf16.msra.mxu0 %v371_v28 }
   0xd   :  { %363 = vmatpush3.bf16.msra.mxu1 %v362_v14 }
   0xe   :  { %364 = vmatprep.subr.bf16.mxu1 %v376_v0 }
  0x11   :  { %366 = vmatpush3.bf16.msra.mxu1 %v365_v17 }
  0xda   :  { %v106_v22 = vpop.f32.mrb[0].mxu0 }
  0xdb   :  { %v107_v23 = vadd.f32 %v292_v21, %v106_v22  ;;  %v321_v24 = vpop.f32.mrb[1].mxu0 }
  0xdd   :  { %v110_v25 = vmax.f32 %v107_v23, 0.0 }
  0xdf   :  { %339 = vmatmul.mubr.msk.f32.vlgmr.msra.gmra.mrb[0].mxu1 %vm126_vm2, %v110_v25 }
 0x1b2   :  { %v196_v30 = vpop.f32.mrb[0].mxu1 }
 0x1b3   :  { %v197_v31 = vadd.f32 %v294_v29, %v196_v30  ;;  %v340_v32 = vpop.f32.mrb[1].mxu1 }
 0x1b5   :  { %v200_v33 = vmax.f32 %v197_v31, 0.0 }
 0x1b7   :  { %350 = vmatmul.mubr.msk.f32.vlgmr.msra.gmra.mrb[2].mxu0 %vm212_vm3, %v200_v33 }
 0x28a   :  { %v282_v35 = vpop.f32.mrb[2].mxu0 }
 0x28b   :  { %v283_v36 = vadd.f32 %v296_v34, %v282_v35  ;;  %v351_v37 = vpop.f32.mrb[3].mxu0 }
 0x28d   :  { %v286_v38 = vpack.c.bf16 %v283_v36, %v283_v36 }
 0x28f   :  { %287 = vst [vmem:[%s486_s7] sm:$0xf] %v286_v38 }

</bundles_post_ra>
